<compile_context>
chip_gen: v7x
topology: tpu7x:2x2x1
jax: 0.10.0
libtpu: 0.0.40
codegen_flags: <defaults>
</compile_context>

<pallas_src>
import functools

import jax
import jax.numpy as jnp
from jax.experimental import pallas as pl
from jax.experimental.pallas import tpu as pltpu


def _round_up(x: int, m: int) -> int:
    return ((x + m - 1) // m) * m


def _linear_kernel(x_ref, wt_ref, o_ref, acc_ref):
    # x_ref: (tm, tk), wt_ref: (tk, tn), o_ref: (tm, tn), acc_ref: (tm, tn) f32
    @pl.when(pl.program_id(2) == 0)
    def _():
        acc_ref[...] = jnp.zeros_like(acc_ref)

    acc_ref[...] += jnp.dot(
        x_ref[...], wt_ref[...], preferred_element_type=jnp.float32
    )

    @pl.when(pl.program_id(2) == pl.num_programs(2) - 1)
    def _():
        o_ref[...] = acc_ref[...].astype(o_ref.dtype)


@functools.partial(jax.jit, static_argnames=("tm", "tn", "tk"))
def linear_no_bias(x, weight, *, tm=256, tn=256, tk=512):
    """Compute x @ weight.T with a tiled Pallas TPU kernel.

    x:      (B, IN)   float32
    weight: (OUT, IN) float32  (PyTorch nn.Linear weight layout)
    returns (B, OUT)  float32
    """
    B, IN = x.shape
    OUT, IN_w = weight.shape
    assert IN == IN_w, "input_size mismatch"

    # One-time HBM-side transpose: (OUT, IN) -> (IN, OUT); kernel never transposes.
    wt = weight.T

    # Clamp tile sizes to the (padded) problem, keeping (8, 128) alignment.
    tm = min(tm, _round_up(B, 8))
    tn = min(tn, _round_up(OUT, 128))
    tk = min(tk, _round_up(IN, 128))

    m_pad = _round_up(B, tm)
    n_pad = _round_up(OUT, tn)
    k_pad = _round_up(IN, tk)

    x_p = jnp.pad(x, ((0, m_pad - B), (0, k_pad - IN)))
    wt_p = jnp.pad(wt, ((0, k_pad - IN), (0, n_pad - OUT)))

    grid = (m_pad // tm, n_pad // tn, k_pad // tk)

    out_padded = pl.pallas_call(
        _linear_kernel,
        out_shape=jax.ShapeDtypeStruct((m_pad, n_pad), x.dtype),
        grid_spec=pltpu.PrefetchScalarGridSpec(
            num_scalar_prefetch=0,
            grid=grid,
            in_specs=[
                pl.BlockSpec((tm, tk), lambda i, j, k: (i, k)),
                pl.BlockSpec((tk, tn), lambda i, j, k: (k, j)),
            ],
            out_specs=pl.BlockSpec((tm, tn), lambda i, j, k: (i, j)),
            scratch_shapes=[pltpu.VMEM((tm, tn), jnp.float32)],
        ),
        compiler_params=pltpu.CompilerParams(
            dimension_semantics=("parallel", "parallel", "arbitrary"),
        ),
        cost_estimate=pl.CostEstimate(
            flops=2 * B * IN * OUT,
            transcendentals=0,
            bytes_accessed=4 * (B * IN + IN * OUT + B * OUT),
        ),
    )(x_p, wt_p)

    return out_padded[:B, :OUT]


if __name__ == "__main__":
    # Small shapes consistent with the module: nn.Linear(input_size=32, output_size=16), batch=8
    input_size = 32
    output_size = 16
    batch = 8

    key = jax.random.PRNGKey(0)
    k_w, k_x = jax.random.split(key)
    # Mirrors nn.init.normal_(weight, 0.0, 1.0)
    weight = jax.random.normal(k_w, (output_size, input_size), dtype=jnp.float32)
    x = jax.random.normal(k_x, (batch, input_size), dtype=jnp.float32)

    y = linear_no_bias(x, weight)
    y = jax.block_until_ready(y)

    # Sanity check against plain JAX reference
    y_ref = x @ weight.T
    assert y.shape == (batch, output_size)
    assert jnp.allclose(y, y_ref, atol=1e-5, rtol=1e-5), "mismatch vs reference"

    print("KERNEL_OK")
</pallas_src>

<mosaic_0001>
module attributes {stable_mosaic.version = 11 : i64} {
  func.func @_linear_kernel(%arg0: i32, %arg1: i32, %arg2: i32, %arg3: memref<8x128xf32, #tpu.memory_space<vmem>>, %arg4: memref<128x128xf32, #tpu.memory_space<vmem>>, %arg5: memref<8x128xf32, #tpu.memory_space<vmem>>, %arg6: memref<8x128xf32, #tpu.memory_space<vmem>>) attributes {dimension_semantics = [#tpu.dimension_semantics<parallel>, #tpu.dimension_semantics<parallel>, #tpu.dimension_semantics<arbitrary>], iteration_bounds = array<i64: 1, 1, 1>, scalar_prefetch = 0 : i64, scratch_operands = 1 : i64, tpu.core_type = #tpu.core_type<tc>, window_params = [{transform_indices = @transform_0, window_bounds = array<i64: 8, 128>}, {transform_indices = @transform_1, window_bounds = array<i64: 128, 128>}, {transform_indices = @transform_2, window_bounds = array<i64: 8, 128>}]} {
    %c0_i32 = arith.constant 0 : i32
    %0 = arith.cmpi eq, %arg2, %c0_i32 : i32
    %1 = arith.extui %0 : i1 to i32
    %c0_i32_0 = arith.constant 0 : i32
    %2 = arith.cmpi ne, %1, %c0_i32_0 : i32
    scf.if %2 {
      %cst_10 = arith.constant 0.000000e+00 : f32
      %12 = vector.broadcast %cst_10 : f32 to vector<8x128xf32>
      %c0_11 = arith.constant 0 : index
      %c0_12 = arith.constant 0 : index
      %13 = vector.load %arg6[%c0_11, %c0_12] : memref<8x128xf32, #tpu.memory_space<vmem>>, vector<8x128xf32>
      tpu.vector_store %arg6[%c0_11, %c0_12], %12 {strides = array<i32>} : memref<8x128xf32, #tpu.memory_space<vmem>>, vector<8x128xf32>,
    } else {
    }
    %c0 = arith.constant 0 : index
    %c0_1 = arith.constant 0 : index
    %3 = vector.load %arg6[%c0, %c0_1] : memref<8x128xf32, #tpu.memory_space<vmem>>, vector<8x128xf32>
    %c0_2 = arith.constant 0 : index
    %c0_3 = arith.constant 0 : index
    %4 = vector.load %arg3[%c0_2, %c0_3] : memref<8x128xf32, #tpu.memory_space<vmem>>, vector<8x128xf32>
    %c0_4 = arith.constant 0 : index
    %c0_5 = arith.constant 0 : index
    %5 = vector.load %arg4[%c0_4, %c0_5] : memref<128x128xf32, #tpu.memory_space<vmem>>, vector<128x128xf32>
    %cst = arith.constant dense<0.000000e+00> : vector<8x128xf32>
    %6 = tpu.matmul %4, %5, %cst {dimension_numbers = #tpu.dot_dimension_numbers<[1], [0], [0], [1], [0, 0, 1, 1], [], []>} : vector<8x128xf32>, vector<128x128xf32>, vector<8x128xf32> -> vector<8x128xf32>
    %7 = arith.addf %3, %6 : vector<8x128xf32>
    %c0_6 = arith.constant 0 : index
    %c0_7 = arith.constant 0 : index
    %8 = vector.load %arg6[%c0_6, %c0_7] : memref<8x128xf32, #tpu.memory_space<vmem>>, vector<8x128xf32>
    tpu.vector_store %arg6[%c0_6, %c0_7], %7 {strides = array<i32>} : memref<8x128xf32, #tpu.memory_space<vmem>>, vector<8x128xf32>,
    %c0_i32_8 = arith.constant 0 : i32
    %9 = arith.cmpi eq, %arg2, %c0_i32_8 : i32
    %10 = arith.extui %9 : i1 to i32
    %c0_i32_9 = arith.constant 0 : i32
    %11 = arith.cmpi ne, %10, %c0_i32_9 : i32
    scf.if %11 {
      %c0_10 = arith.constant 0 : index
      %c0_11 = arith.constant 0 : index
      %12 = vector.load %arg6[%c0_10, %c0_11] : memref<8x128xf32, #tpu.memory_space<vmem>>, vector<8x128xf32>
      %c0_12 = arith.constant 0 : index
      %c0_13 = arith.constant 0 : index
      %13 = vector.load %arg5[%c0_12, %c0_13] : memref<8x128xf32, #tpu.memory_space<vmem>>, vector<8x128xf32>
      tpu.vector_store %arg5[%c0_12, %c0_13], %12 {strides = array<i32>} : memref<8x128xf32, #tpu.memory_space<vmem>>, vector<8x128xf32>,
    } else {
    }
    return
  }
  func.func @transform_0(%arg0: i32, %arg1: i32, %arg2: i32) -> (i32, i32) {
    %c0_i32 = arith.constant 0 : i32
    return %arg0, %arg2 : i32, i32
  }
  func.func @transform_1(%arg0: i32, %arg1: i32, %arg2: i32) -> (i32, i32) {
    %c0_i32 = arith.constant 0 : i32
    return %arg2, %arg1 : i32, i32
  }
  func.func @transform_2(%arg0: i32, %arg1: i32, %arg2: i32) -> (i32, i32) {
    %c0_i32 = arith.constant 0 : i32
    return %arg0, %arg1 : i32, i32
  }
}

</mosaic_0001>

<bundles_post_ra>
// kernel: linear_no_bias.1
= control target key start
LH: loop header
LB: loop body
LE: loop exit
PB: predicated region body
PF: predicated region fallthrough
CT: control target
= control target key end

     0   :  { %v230_v3 = vmov 0.0|0.0   ;;  %vm231_vm0 = vmmov 0   ;;  %v232_v6 = vmov 0.0   ;;  %s312_s0 = inlined_call_operand.vmem [shape: f32[8,128], index: 0, kind: input, shape index: {}]   ;;  %s313_s1 = inlined_call_operand.vmem [shape: f32[128,128], index: 1, kind: input, shape index: {}]   ;;  %s314_s2 = inlined_call_operand.hbm [shape: f32[8,128], index: 2, kind: output, shape index: {}]  }
   0x1   :  { %v19_v0 = vld [vmem:[%s313_s1] sm:$0xff]  ;;  %v20_v1 = vld [vmem:[%s313_s1 + $0x8] sm:$0xff]  ;;  %v21_v2 = vld [vmem:[%s313_s1 + $0x10] sm:$0xff]  ;;  %178 = vmatprep.subr.bf16.mxu0 %v230_v3  ;;  %175 = vmatprep.mubr.msk.f32.mxu0 %vm231_vm0, %v232_v6 }
   0x2   :  { %v179_v4 = vpack.c.bf16 %v20_v1, %v19_v0  ;;  %v22_v5 = vld [vmem:[%s313_s1 + $0x18] sm:$0xff]  ;;  %v23_v8 = vld [vmem:[%s313_s1 + $0x20] sm:$0xff]  ;;  %v24_v9 = vld [vmem:[%s313_s1 + $0x28] sm:$0xff] }
   0x3   :  { %v182_v7 = vpack.c.bf16 %v22_v5, %v21_v2 }
   0x4   :  { %180 = vmatpush3.bf16.msra.mxu0 %v179_v4 }
   0x5   :  { %181 = vmatprep.subr.bf16.mxu0 %v230_v3 }
   0x6   :  { %7 = vsyncpa [#allocation4], 0  ;;  %v185_v10 = vpack.c.bf16 %v24_v9, %v23_v8  ;;  %v25_v11 = vld [vmem:[%s313_s1 + $0x30] sm:$0xff]  ;;  %v26_v12 = vld [vmem:[%s313_s1 + $0x38] sm:$0xff]  ;;  %s233_s15 = smov [#allocation3]  }
   0x7   :  { %v188_v13 = vpack.c.bf16 %v26_v12, %v25_v11  ;;  %v27_v14 = vld [vmem:[%s313_s1 + $0x40] sm:$0xff]  ;;  %v28_v15 = vld [vmem:[%s313_s1 + $0x48] sm:$0xff]  ;;  %v29_v17 = vld [vmem:[%s313_s1 + $0x50] sm:$0xff]  ;;  %s118_s16 = sshll.u32 %s233_s15, 4  ;;  %s119_s16 = int_to_ptr.vmem [resolvable:$true] %s118_s16 }
   0x8   :  { %183 = vmatpush3.bf16.msra.mxu0 %v182_v7  ;;  %v191_v16 = vpack.c.bf16 %v28_v15, %v27_v14  ;;  %v30_v18 = vld [vmem:[%s313_s1 + $0x58] sm:$0xff]  ;;  %v31_v20 = vld [vmem:[%s313_s1 + $0x60] sm:$0xff]  ;;  %v32_v21 = vld [vmem:[%s313_s1 + $0x68] sm:$0xff]  ;;  %s206_s17 = scalar_lea.vmem %s119_s16, 128  ;;  %p211_p1 = scmp.lt.s32.totalorder %s119_s16, %s119_s16 }
   0x9   :  { %184 = vmatprep.subr.bf16.mxu0 %v230_v3  ;;  %v194_v19 = vpack.c.bf16 %v30_v18, %v29_v17  ;;  %v197_v22 = vpack.c.bf16 %v32_v21, %v31_v20  ;;  %v33_v23 = vld [vmem:[%s313_s1 + $0x70] sm:$0xff]  ;;  %v34_v24 = vld [vmem:[%s313_s1 + $0x78] sm:$0xff]  ;;  %v18_v26 = vld [vmem:[%s312_s0] sm:$0xff]  ;;  %p207_p0 = scmp.ne.s32.totalorder %s119_s16, %s206_s17  ;;  %p212_p2 = scmp.lt.s32.totalorder %s206_s17, %s206_s17 }
   0xa   :  { %v200_v25 = vpack.c.bf16 %v34_v24, %v33_v23 }
   0xb   :  { %p213_p3 = por %p212_p2, %p211_p1 }
   0xc   :  { %186 = vmatpush3.bf16.msra.mxu0 %v185_v10 }
   0xd   :  { %187 = vmatprep.subr.bf16.mxu0 %v230_v3  ;;  %p214_p4 = pnand %p213_p3, %p207_p0 }
  0x10   :  { %189 = vmatpush3.bf16.msra.mxu0 %v188_v13 }
  0x11   :  { %190 = vmatprep.subr.bf16.mxu0 %v230_v3 }
  0x14   :  { %192 = vmatpush3.bf16.msra.mxu0 %v191_v16 }
  0x15   :  { %193 = vmatprep.subr.bf16.mxu0 %v230_v3 }
  0x18   :  { %195 = vmatpush3.bf16.msra.mxu0 %v194_v19 }
  0x19   :  { %196 = vmatprep.subr.bf16.mxu0 %v230_v3 }
  0x1c   :  { %198 = vmatpush3.bf16.msra.mxu0 %v197_v22 }
  0x1d   :  { %199 = vmatprep.subr.bf16.mxu0 %v230_v3 }
  0x20   :  { %201 = vmatpush3.bf16.msra.mxu0 %v200_v25 }
  0x23   :  { %176 = vmatmul.mubr.f32.vlgmr.msra.gmra.mrb[0].mxu0 %v18_v26 }
  0xf6   :  { %v101_v27 = vpop.f32.mrb[0].mxu0 }
  0xf7   :  { %111 = vst [vmem:[#allocation3] sm:$0xff] %v101_v27  ;;  %v177_v28 = vpop.f32.mrb[1].mxu0 }
  0xf8   :  { %217 = shalt.err (!%p214_p4)
}
  0xf9   :  { %s218_s19 = scalar_lea.hbm %s314_s2, 128 }
  0xfa   :  { %p219_p5 = scmp.ne.s32.totalorder %s314_s2, %s218_s19  ;;  %p222_p6 = scmp.lt.u32.totalorder %s218_s19, %s314_s2 }
  0xfc   :  { %p224_p7 = pnand %p222_p6, %p219_p5 }
  0xfe   :  { %227 = shalt.err (!%p224_p7)
}
  0xff   :  { %121 = dma.vmem_to_hbm [thread:$0]  %s119_s16, 128, %s314_s2, [#allocation4]  }
 0x100   :  { %228 = dma.done.wait [#allocation4], 128  }
 0x101   :  { %229 = vsyncadd [#allocation4], 4294967168 }
 0x102   :  { %125 = vsyncpa [#allocation4], 1 }

</bundles_post_ra>
